<compile_context>
chip_gen: v7x
topology: tpu7x:2x2x1
jax: 0.10.0
libtpu: 0.0.40
codegen_flags: <defaults>
</compile_context>

<pallas_src>
import functools

import jax
import jax.numpy as jnp
from jax.experimental import pallas as pl
from jax.experimental.pallas import tpu as pltpu


# Packed layout (all lane-aligned):
#   w1    : [4, 128]      bf16  shared Linear(4, 64) weight, cols 64:128 zero
#   wslab : [3, 128, 128] bf16
#             slab[0][0:64, 0:64]   -> shared Linear(64, 64)
#             slab[1][0:64, 0:32]   -> value  Linear(64, 32)
#             slab[1][0:64, 32:64]  -> policy Linear(64, 32)
#             slab[2][0:32, 0:1]    -> value  Linear(32, 1)   (lane 0)
#             slab[2][32:64, 1:3]   -> policy Linear(32, 2)   (lanes 1:3)
#   bslab : [4, 128]      f32   row 0 -> b1, row 1 -> b2, row 2 -> [bv1|bp1],
#                               row 3 -> lane 0 bv2, lanes 1:3 bp2 (rest zero)
#   out   : [B, 128]      f32   lane 0 -> V, lanes 1:3 -> softmax probs, rest 0


def dualnet_kernel(x_ref, w1_ref, wslab_ref, bslab_ref, out_ref):
    x = x_ref[...].astype(jnp.bfloat16)          # [bb, 4]

    # Full-width 128-lane bias rows (no half-lane slices).
    b1 = bslab_ref[0:1, :]                       # [1, 128] f32
    b2 = bslab_ref[1:2, :]
    bh = bslab_ref[2:3, :]
    bo = bslab_ref[3:4, :]

    # Leading-axis indexing of the [3,128,128] slab: free lane-aligned views.
    w2 = wslab_ref[0]                            # [128, 128] bf16
    wh = wslab_ref[1]
    wo = wslab_ref[2]

    # ---- shared trunk: Linear -> ReLU -> Linear -> ReLU (padded to 128) ----
    h = jnp.dot(x, w1_ref[...], preferred_element_type=jnp.float32) + b1
    h = jnp.maximum(h, 0.0)                      # lanes 64:128 stay 0
    h = jnp.dot(h.astype(jnp.bfloat16), w2, preferred_element_type=jnp.float32) + b2
    h = jnp.maximum(h, 0.0)

    # ---- fused value/policy hidden layers: lanes 0:32 = hv, 32:64 = hp ----
    hh = jnp.dot(h.astype(jnp.bfloat16), wh, preferred_element_type=jnp.float32) + bh
    hh = jnp.maximum(hh, 0.0)

    # ---- fused block-diagonal output layer ----
    # y[:, 0] = V, y[:, 1:3] = policy logits, y[:, 3:] = 0.
    y = jnp.dot(hh.astype(jnp.bfloat16), wo, preferred_element_type=jnp.float32) + bo

    # ---- 2-class softmax in closed form: p1 = sigmoid(l1 - l0) on the EUP ----
    l0 = y[:, 1:2]
    l1 = y[:, 2:3]
    d = jnp.minimum(l0 - l1, 60.0)               # guard exp overflow -> no inf
    p1 = pl.reciprocal(1.0 + jnp.exp(d), approx=True)
    p0 = 1.0 - p1

    # Single unmasked 128-lane store: keep V (lane 0) and zero padding from y,
    # overwrite lanes 1 and 2 with the probabilities.
    lane = jax.lax.broadcasted_iota(jnp.int32, y.shape, 1)
    out_ref[...] = jnp.where(lane == 1, p0, jnp.where(lane == 2, p1, y))


@functools.partial(jax.jit, static_argnames=("block_b",))
def dualnet_forward(x, w1, wslab, bslab, *, block_b=512):
    """Returns (V, pi_probs).

    pi_probs are the Categorical probabilities; the torch module wraps them in
    torch.distributions.Categorical, which has no Pallas/array equivalent.
    """
    B = x.shape[0]

    # Batch grid, gated on batch size: small B -> single block (grid of 1);
    # large B -> fixed-size batch blocks so VMEM residency is bounded on
    # v7x/v5e and the batch axis can shard across v7x's two TensorCores.
    if B <= block_b:
        bb, Bp, xp = B, B, x
    else:
        bb = block_b                              # multiple of 8
        Bp = ((B + bb - 1) // bb) * bb
        xp = jnp.pad(x, ((0, Bp - B), (0, 0)))
    grid = (Bp // bb,)

    flops = 2 * Bp * (4 * 128 + 3 * 128 * 128)
    bytes_accessed = (4 * xp.size + 2 * (w1.size + wslab.size)
                      + 4 * bslab.size + 4 * Bp * 128)

    out = pl.pallas_call(
        dualnet_kernel,
        out_shape=jax.ShapeDtypeStruct((Bp, 128), jnp.float32),
        grid_spec=pltpu.PrefetchScalarGridSpec(
            num_scalar_prefetch=0,
            grid=grid,
            in_specs=[
                pl.BlockSpec((bb, 4), lambda i: (i, 0)),          # x
                pl.BlockSpec((4, 128), lambda i: (0, 0)),         # w1 (DMA once)
                pl.BlockSpec((3, 128, 128), lambda i: (0, 0, 0)), # wslab (DMA once)
                pl.BlockSpec((4, 128), lambda i: (0, 0)),         # bslab (DMA once)
            ],
            out_specs=pl.BlockSpec((bb, 128), lambda i: (i, 0)),
        ),
        compiler_params=pltpu.CompilerParams(
            dimension_semantics=("parallel",)),
        cost_estimate=pl.CostEstimate(
            flops=flops, transcendentals=Bp, bytes_accessed=bytes_accessed),
    )(xp, w1, wslab, bslab)

    out = out[:B]
    V = out[:, 0:1]
    pi = out[:, 1:3]
    return V, pi


def _init_linear(key, fan_in, fan_out):
    """PyTorch-style Linear init: U(-1/sqrt(fan_in), 1/sqrt(fan_in)).

    Weight stored [in, out] (transposed vs torch) so the kernel does x @ W.
    Bias stored [1, out].
    """
    kw, kb = jax.random.split(key)
    bound = 1.0 / float(fan_in) ** 0.5
    w = jax.random.uniform(kw, (fan_in, fan_out), jnp.float32, -bound, bound)
    b = jax.random.uniform(kb, (1, fan_out), jnp.float32, -bound, bound)
    return w, b


def init_dualnet_params(key):
    keys = jax.random.split(key, 6)
    w1, b1 = _init_linear(keys[0], 4, 64)     # shared_layers[0]
    w2, b2 = _init_linear(keys[1], 64, 64)    # shared_layers[2]
    wv1, bv1 = _init_linear(keys[2], 64, 32)  # value_layers[0]
    wv2, bv2 = _init_linear(keys[3], 32, 1)   # value_layers[2]
    wp1, bp1 = _init_linear(keys[4], 64, 32)  # policy_layers[0]
    wp2, bp2 = _init_linear(keys[5], 32, 2)   # policy_layers[2]
    return (w1, b1, w2, b2, wv1, bv1, wv2, bv2, wp1, bp1, wp2, bp2)


def pack_dualnet_params(params):
    """Pack the 12 raw tensors into (w1, wslab, bslab). Done once, outside jit."""
    (w1, b1, w2, b2, wv1, bv1, wv2, bv2, wp1, bp1, wp2, bp2) = params

    w1p = jnp.zeros((4, 128), jnp.float32).at[:, 0:64].set(w1)

    wslab = jnp.zeros((3, 128, 128), jnp.float32)
    wslab = wslab.at[0, 0:64, 0:64].set(w2)       # shared Linear(64,64)
    wslab = wslab.at[1, 0:64, 0:32].set(wv1)      # value  Linear(64,32)
    wslab = wslab.at[1, 0:64, 32:64].set(wp1)     # policy Linear(64,32)
    wslab = wslab.at[2, 0:32, 0:1].set(wv2)       # value  Linear(32,1)  -> lane 0
    wslab = wslab.at[2, 32:64, 1:3].set(wp2)      # policy Linear(32,2)  -> lanes 1:3

    bslab = jnp.zeros((4, 128), jnp.float32)
    bslab = bslab.at[0, 0:64].set(b1[0])
    bslab = bslab.at[1, 0:64].set(b2[0])
    bslab = bslab.at[2, 0:32].set(bv1[0])
    bslab = bslab.at[2, 32:64].set(bp1[0])
    bslab = bslab.at[3, 0:1].set(bv2[0])
    bslab = bslab.at[3, 1:3].set(bp2[0])

    return w1p.astype(jnp.bfloat16), wslab.astype(jnp.bfloat16), bslab


def _reference_forward(x, params):
    """Pure-JAX f32 reference (mirrors the PyTorch module)."""
    (w1, b1, w2, b2, wv1, bv1, wv2, bv2, wp1, bp1, wp2, bp2) = params
    h = jnp.maximum(x @ w1 + b1, 0.0)
    h = jnp.maximum(h @ w2 + b2, 0.0)
    v = jnp.maximum(h @ wv1 + bv1, 0.0) @ wv2 + bv2
    logits = jnp.maximum(h @ wp1 + bp1, 0.0) @ wp2 + bp2
    pi = jax.nn.softmax(logits, axis=-1)
    return v, pi


if __name__ == "__main__":
    key = jax.random.PRNGKey(0)
    kp, kx = jax.random.split(key)

    params = init_dualnet_params(kp)
    w1p, wslab, bslab = pack_dualnet_params(params)

    # CartPole observation: 4 features; small batch of 8 (single-block path).
    x = jax.random.normal(kx, (8, 4), jnp.float32)
    V, pi = dualnet_forward(x, w1p, wslab, bslab)
    jax.block_until_ready((V, pi))

    V_ref, pi_ref = _reference_forward(x, params)
    assert V.shape == (8, 1) and pi.shape == (8, 2)
    # bf16 matmuls -> relaxed tolerance vs the f32 reference.
    assert jnp.allclose(V, V_ref, atol=3e-2, rtol=3e-2)
    assert jnp.allclose(pi, pi_ref, atol=3e-2, rtol=3e-2)
    assert jnp.allclose(jnp.sum(pi, axis=-1), 1.0, atol=1e-5)

    # Larger batch exercises the gridded / "parallel" megacore path.
    xb = jax.random.normal(kx, (2048, 4), jnp.float32)
    Vb, pib = dualnet_forward(xb, w1p, wslab, bslab, block_b=512)
    jax.block_until_ready((Vb, pib))
    Vb_ref, pib_ref = _reference_forward(xb, params)
    assert Vb.shape == (2048, 1) and pib.shape == (2048, 2)
    assert jnp.allclose(Vb, Vb_ref, atol=3e-2, rtol=3e-2)
    assert jnp.allclose(pib, pib_ref, atol=3e-2, rtol=3e-2)

    # TODO(synk): torch.distributions.Categorical wrapper has no array-level
    # equivalent; we return the softmax probabilities that parameterize it.
    print("KERNEL_OK")
</pallas_src>

<mosaic_0001>
module attributes {stable_mosaic.version = 11 : i64} {
  func.func @dualnet_kernel(%arg0: i32, %arg1: memref<8x4xf32, #tpu.memory_space<vmem>>, %arg2: memref<4x128xbf16, #tpu.memory_space<vmem>>, %arg3: memref<3x128x128xbf16, #tpu.memory_space<vmem>>, %arg4: memref<4x128xf32, #tpu.memory_space<vmem>>, %arg5: memref<8x128xf32, #tpu.memory_space<vmem>>) attributes {dimension_semantics = [#tpu.dimension_semantics<parallel>], iteration_bounds = array<i64: 1>, scalar_prefetch = 0 : i64, scratch_operands = 0 : i64, tpu.core_type = #tpu.core_type<tc>, window_params = [{transform_indices = @transform_0, window_bounds = array<i64: 8, 4>}, {pipeline_mode = #tpu.pipeline_mode<synchronous>, transform_indices = @transform_1, window_bounds = array<i64: 4, 128>}, {pipeline_mode = #tpu.pipeline_mode<synchronous>, transform_indices = @transform_2, window_bounds = array<i64: 3, 128, 128>}, {pipeline_mode = #tpu.pipeline_mode<synchronous>, transform_indices = @transform_3, window_bounds = array<i64: 4, 128>}, {transform_indices = @transform_4, window_bounds = array<i64: 8, 128>}]} {
    %c0 = arith.constant 0 : index
    %c0_0 = arith.constant 0 : index
    %0 = vector.load %arg1[%c0, %c0_0] : memref<8x4xf32, #tpu.memory_space<vmem>>, vector<8x4xf32>
    %1 = arith.truncf %0 : vector<8x4xf32> to vector<8x4xbf16>
    %c0_1 = arith.constant 0 : index
    %c0_2 = arith.constant 0 : index
    %2 = vector.load %arg4[%c0_1, %c0_2] : memref<4x128xf32, #tpu.memory_space<vmem>>, vector<1x128xf32>
    %c1 = arith.constant 1 : index
    %c0_3 = arith.constant 0 : index
    %3 = vector.load %arg4[%c1, %c0_3] : memref<4x128xf32, #tpu.memory_space<vmem>>, vector<1x128xf32>
    %c2 = arith.constant 2 : index
    %c0_4 = arith.constant 0 : index
    %4 = vector.load %arg4[%c2, %c0_4] : memref<4x128xf32, #tpu.memory_space<vmem>>, vector<1x128xf32>
    %c3 = arith.constant 3 : index
    %c0_5 = arith.constant 0 : index
    %5 = vector.load %arg4[%c3, %c0_5] : memref<4x128xf32, #tpu.memory_space<vmem>>, vector<1x128xf32>
    %c0_6 = arith.constant 0 : index
    %c0_7 = arith.constant 0 : index
    %c0_8 = arith.constant 0 : index
    %6 = vector.load %arg3[%c0_6, %c0_7, %c0_8] : memref<3x128x128xbf16, #tpu.memory_space<vmem>>, vector<1x128x128xbf16>
    %7 = vector.shape_cast %6 : vector<1x128x128xbf16> to vector<128x128xbf16>
    %c1_9 = arith.constant 1 : index
    %c0_10 = arith.constant 0 : index
    %c0_11 = arith.constant 0 : index
    %8 = vector.load %arg3[%c1_9, %c0_10, %c0_11] : memref<3x128x128xbf16, #tpu.memory_space<vmem>>, vector<1x128x128xbf16>
    %9 = vector.shape_cast %8 : vector<1x128x128xbf16> to vector<128x128xbf16>
    %c2_12 = arith.constant 2 : index
    %c0_13 = arith.constant 0 : index
    %c0_14 = arith.constant 0 : index
    %10 = vector.load %arg3[%c2_12, %c0_13, %c0_14] : memref<3x128x128xbf16, #tpu.memory_space<vmem>>, vector<1x128x128xbf16>
    %11 = vector.shape_cast %10 : vector<1x128x128xbf16> to vector<128x128xbf16>
    %c0_15 = arith.constant 0 : index
    %c0_16 = arith.constant 0 : index
    %12 = vector.load %arg2[%c0_15, %c0_16] : memref<4x128xbf16, #tpu.memory_space<vmem>>, vector<4x128xbf16>
    %cst = arith.constant dense<0.000000e+00> : vector<8x128xf32>
    %13 = tpu.matmul %1, %12, %cst {dimension_numbers = #tpu.dot_dimension_numbers<[1], [0], [0], [1], [0, 0, 1, 1], [], []>} : vector<8x4xbf16>, vector<4x128xbf16>, vector<8x128xf32> -> vector<8x128xf32>
    %14 = vector.broadcast %2 : vector<1x128xf32> to vector<8x128xf32>
    %15 = arith.addf %13, %14 : vector<8x128xf32>
    %cst_17 = arith.constant 0.000000e+00 : f32
    %16 = vector.broadcast %cst_17 : f32 to vector<8x128xf32>
    %17 = arith.maximumf %15, %16 : vector<8x128xf32>
    %18 = arith.truncf %17 : vector<8x128xf32> to vector<8x128xbf16>
    %cst_18 = arith.constant dense<0.000000e+00> : vector<8x128xf32>
    %19 = tpu.matmul %18, %7, %cst_18 {dimension_numbers = #tpu.dot_dimension_numbers<[1], [0], [0], [1], [0, 0, 1, 1], [], []>} : vector<8x128xbf16>, vector<128x128xbf16>, vector<8x128xf32> -> vector<8x128xf32>
    %20 = vector.broadcast %3 : vector<1x128xf32> to vector<8x128xf32>
    %21 = arith.addf %19, %20 : vector<8x128xf32>
    %cst_19 = arith.constant 0.000000e+00 : f32
    %22 = vector.broadcast %cst_19 : f32 to vector<8x128xf32>
    %23 = arith.maximumf %21, %22 : vector<8x128xf32>
    %24 = arith.truncf %23 : vector<8x128xf32> to vector<8x128xbf16>
    %cst_20 = arith.constant dense<0.000000e+00> : vector<8x128xf32>
    %25 = tpu.matmul %24, %9, %cst_20 {dimension_numbers = #tpu.dot_dimension_numbers<[1], [0], [0], [1], [0, 0, 1, 1], [], []>} : vector<8x128xbf16>, vector<128x128xbf16>, vector<8x128xf32> -> vector<8x128xf32>
    %26 = vector.broadcast %4 : vector<1x128xf32> to vector<8x128xf32>
    %27 = arith.addf %25, %26 : vector<8x128xf32>
    %cst_21 = arith.constant 0.000000e+00 : f32
    %28 = vector.broadcast %cst_21 : f32 to vector<8x128xf32>
    %29 = arith.maximumf %27, %28 : vector<8x128xf32>
    %30 = arith.truncf %29 : vector<8x128xf32> to vector<8x128xbf16>
    %cst_22 = arith.constant dense<0.000000e+00> : vector<8x128xf32>
    %31 = tpu.matmul %30, %11, %cst_22 {dimension_numbers = #tpu.dot_dimension_numbers<[1], [0], [0], [1], [0, 0, 1, 1], [], []>} : vector<8x128xbf16>, vector<128x128xbf16>, vector<8x128xf32> -> vector<8x128xf32>
    %32 = vector.broadcast %5 : vector<1x128xf32> to vector<8x128xf32>
    %33 = arith.addf %31, %32 : vector<8x128xf32>
    %34 = vector.extract_strided_slice %33 {offsets = [0, 1], sizes = [8, 1], strides = [1, 1]} : vector<8x128xf32> to vector<8x1xf32>
    %35 = vector.extract_strided_slice %33 {offsets = [0, 2], sizes = [8, 1], strides = [1, 1]} : vector<8x128xf32> to vector<8x1xf32>
    %36 = arith.subf %34, %35 : vector<8x1xf32>
    %cst_23 = arith.constant 6.000000e+01 : f32
    %37 = vector.broadcast %cst_23 : f32 to vector<8x1xf32>
    %38 = arith.minimumf %36, %37 : vector<8x1xf32>
    %39 = math.exp %38 : vector<8x1xf32>
    %cst_24 = arith.constant 1.000000e+00 : f32
    %40 = vector.broadcast %cst_24 : f32 to vector<8x1xf32>
    %41 = arith.addf %40, %39 : vector<8x1xf32>
    %42 = tpu.reciprocal %41 {approx = true} : vector<8x1xf32> -> vector<8x1xf32>
    %cst_25 = arith.constant 1.000000e+00 : f32
    %43 = vector.broadcast %cst_25 : f32 to vector<8x1xf32>
    %44 = arith.subf %43, %42 : vector<8x1xf32>
    %45 = tpu.iota {dimensions = array<i32: 1>} : vector<8x128xi32>
    %c1_i32 = arith.constant 1 : i32
    %46 = vector.broadcast %c1_i32 : i32 to vector<8x128xi32>
    %47 = arith.cmpi eq, %45, %46 : vector<8x128xi32>
    %c2_i32 = arith.constant 2 : i32
    %48 = vector.broadcast %c2_i32 : i32 to vector<8x128xi32>
    %49 = arith.cmpi eq, %45, %48 : vector<8x128xi32>
    %50 = vector.shape_cast %42 : vector<8x1xf32> to vector<8x1xf32>
    %51 = vector.broadcast %50 : vector<8x1xf32> to vector<8x128xf32>
    %52 = arith.select %49, %51, %33 : vector<8x128xi1>, vector<8x128xf32>
    %53 = vector.shape_cast %44 : vector<8x1xf32> to vector<8x1xf32>
    %54 = vector.broadcast %53 : vector<8x1xf32> to vector<8x128xf32>
    %55 = arith.select %47, %54, %52 : vector<8x128xi1>, vector<8x128xf32>
    %c0_26 = arith.constant 0 : index
    %c0_27 = arith.constant 0 : index
    %56 = vector.load %arg5[%c0_26, %c0_27] : memref<8x128xf32, #tpu.memory_space<vmem>>, vector<8x128xf32>
    tpu.vector_store %arg5[%c0_26, %c0_27], %55 {strides = array<i32>} : memref<8x128xf32, #tpu.memory_space<vmem>>, vector<8x128xf32>,
    return
  }
  func.func @transform_0(%arg0: i32) -> (i32, i32) {
    %c0_i32 = arith.constant 0 : i32
    %c0_i32_0 = arith.constant 0 : i32
    return %arg0, %c0_i32 : i32, i32
  }
  func.func @transform_1(%arg0: i32) -> (i32, i32) {
    %c0_i32 = arith.constant 0 : i32
    %c0_i32_0 = arith.constant 0 : i32
    %c0_i32_1 = arith.constant 0 : i32
    return %c0_i32, %c0_i32_0 : i32, i32
  }
  func.func @transform_2(%arg0: i32) -> (i32, i32, i32) {
    %c0_i32 = arith.constant 0 : i32
    %c0_i32_0 = arith.constant 0 : i32
    %c0_i32_1 = arith.constant 0 : i32
    %c0_i32_2 = arith.constant 0 : i32
    return %c0_i32, %c0_i32_0, %c0_i32_1 : i32, i32, i32
  }
  func.func @transform_3(%arg0: i32) -> (i32, i32) {
    %c0_i32 = arith.constant 0 : i32
    %c0_i32_0 = arith.constant 0 : i32
    %c0_i32_1 = arith.constant 0 : i32
    return %c0_i32, %c0_i32_0 : i32, i32
  }
  func.func @transform_4(%arg0: i32) -> (i32, i32) {
    %c0_i32 = arith.constant 0 : i32
    %c0_i32_0 = arith.constant 0 : i32
    return %arg0, %c0_i32 : i32, i32
  }
}

</mosaic_0001>

<bundles_post_ra>
// kernel: dualnet_forward.1
= control target key start
LH: loop header
LB: loop body
LE: loop exit
PB: predicated region body
PF: predicated region fallthrough
CT: control target
= control target key end

     0   :  { %9 = vsyncpa [#allocation3], 0  ;;  %s641_s15 = smov [#allocation2]   ;;  %s739_s0 = inlined_call_operand.vmem [shape: f32[8,4], index: 0, kind: input, shape index: {}]   ;;  %s740_s1 = inlined_call_operand.vmem [shape: bf16[4,128], index: 1, kind: input, shape index: {}]   ;;  %s741_s2 = inlined_call_operand.hbm [shape: bf16[3,128,128], index: 2, kind: input, shape index: {}]   ;;  %s742_s3 = inlined_call_operand.vmem [shape: f32[4,128], index: 3, kind: input, shape index: {}]   ;;  %s743_s4 = inlined_call_operand.vmem [shape: f32[8,128], index: 4, kind: output, shape index: {}]  }
   0x1   :  { %s19_s16 = sshll.u32 %s641_s15, 4  ;;  %s617_s19 = scalar_lea.hbm %s741_s2, 3072  ;;  %s20_s16 = int_to_ptr.vmem [resolvable:$true] %s19_s16 }
   0x2   :  { %p618_p0 = scmp.ne.s32.totalorder %s741_s2, %s617_s19  ;;  %p621_p1 = scmp.lt.u32.totalorder %s617_s19, %s741_s2 }
   0x4   :  { %p623_p2 = pnand %p621_p1, %p618_p0 }
   0x6   :  { %626 = shalt.err (!%p623_p2)
}
   0x7   :  { %s627_s24 = scalar_lea.vmem %s20_s16, 3072  ;;  %p632_p4 = scmp.lt.s32.totalorder %s20_s16, %s20_s16 }
   0x8   :  { %p628_p3 = scmp.ne.s32.totalorder %s20_s16, %s627_s24  ;;  %p633_p5 = scmp.lt.s32.totalorder %s627_s24, %s627_s24 }
   0xa   :  { %p634_p6 = por %p633_p5, %p632_p4 }
   0xc   :  { %p635_p7 = pnand %p634_p6, %p628_p3 }
   0xe   :  { %638 = shalt.err (!%p635_p7)
}
   0xf   :  { %s642_s25 = smov 64   ;;  %s643_s26 = smov 4  }
  0x10   :  { %25 = dma.hbm_to_vmem [thread:$0]  %s741_s2, 3072, %s20_s16, [#allocation3], %s642_s25, %s642_s25, %s643_s26  }
  0x11   :  { %639 = dma.done.wait [#allocation3], 3072  }
  0x12   :  { %640 = vsyncadd [#allocation3], 4294964224  ;;  %v644_v0 = vmov 0.0   ;;  %vm645_vm0 = vmmov 0   ;;  %vm97_vm1 = vcmask 1041408   ;;  %v32_v2 = vld [vmem:[%s739_s0] sm:$0xff] }
  0x13   :  { %514 = vmatprep.subr.bf16.mxu0 %v644_v0  ;;  %516 = vmatprep.mubr.msk.bf16.mxu0 %vm645_vm0, %v644_v0  ;;  %v88_v1 = vld [vmem:[%s740_s1] sm:$0x3]  ;;  %v33_v4 = vpack.c.bf16 %v32_v2, %v32_v2  ;;  %vm93_vm2 = vcmask 31744   ;;  %v590_v6 = vld [vmem:[#allocation2 + $0x8] sm:$0xff]   ;;  %v591_v7 = vld [vmem:[#allocation2 + $0x10] sm:$0xff]   ;;  %s646_s12 = smov 127  }
  0x14   :  { %520 = vmatprep.subr.bf16.mxu1 %v644_v0  ;;  %536 = vmatprep.mubr.msk.bf16.mxu1 %vm645_vm0, %v644_v0  ;;  %v99_v3 = vsel %vm97_vm1, %v88_v1, 0  ;;  %v589_v5 = vld [vmem:[#allocation2] sm:$0xff]   ;;  %v592_v8 = vld [vmem:[#allocation2 + $0x18] sm:$0xff]   ;;  %v594_v10 = vld [vmem:[#allocation2 + $0x28] sm:$0xff]   ;;  %v647_v59 = vmov 1  }
  0x15   :  { %515 = vmatpush3.bf16.msra.mxu0 %v99_v3  ;;  %521 = vmatpush3.bf16.msra.mxu1 %v589_v5  ;;  %v593_v9 = vld [vmem:[#allocation2 + $0x20] sm:$0xff]   ;;  %v595_v11 = vld [vmem:[#allocation2 + $0x30] sm:$0xff]   ;;  %v596_v12 = vld [vmem:[#allocation2 + $0x38] sm:$0xff]  }
  0x16   :  { %540 = vmatprep.subr.bf16.mxu0 %v644_v0  ;;  %522 = vmatprep.subr.bf16.mxu1 %v644_v0  ;;  %v597_v13 = vld [vmem:[#allocation2 + $0x40] sm:$0xff]   ;;  %v598_v14 = vld [vmem:[#allocation2 + $0x48] sm:$0xff]   ;;  %v599_v15 = vld [vmem:[#allocation2 + $0x50] sm:$0xff]  }
  0x17   :  { %v600_v16 = vld [vmem:[#allocation2 + $0x58] sm:$0xff]   ;;  %v601_v17 = vld [vmem:[#allocation2 + $0x60] sm:$0xff]   ;;  %v602_v18 = vld [vmem:[#allocation2 + $0x68] sm:$0xff]   ;;  %587 = vset.pattern.permute.xlu0 %v647_v59  ;;  %588 = vset.pattern.permute.xlu1 %v647_v59 }
  0x18   :  { %517 = vmatmul.mubr.msk.bf16.vlgmr.msra.gmra.mrb[0].mxu0 %vm93_vm2, %v33_v4  ;;  %v456_v19 = vld [vmem:[%s742_s3] ss:$0 sm:$0xff]  ;;  %v603_v27 = vld [vmem:[#allocation2 + $0x70] sm:$0xff]   ;;  %v604_v28 = vld [vmem:[#allocation2 + $0x78] sm:$0xff]   ;;  %v434_v4 = vlaneseq }
  0x19   :  { %556 = vmatprep.mubr.msk.bf16.mxu0 %vm645_vm0, %v644_v0  ;;  %523 = vmatpush3.bf16.msra.mxu1 %v590_v6  ;;  %v605_v29 = vld [vmem:[#allocation2 + $0x80] sm:$0xff]   ;;  %v606_v30 = vld [vmem:[#allocation2 + $0x88] sm:$0xff]   ;;  %v607_v31 = vld [vmem:[#allocation2 + $0x90] sm:$0xff]  }
  0x1a   :  { %524 = vmatprep.subr.bf16.mxu1 %v644_v0  ;;  %541 = vmatpush3.bf16.msra.mxu0 %v597_v13  ;;  %v608_v32 = vld [vmem:[#allocation2 + $0x98] sm:$0xff]   ;;  %v609_v33 = vld [vmem:[#allocation2 + $0xa0] sm:$0xff]   ;;  %v610_v34 = vld [vmem:[#allocation2 + $0xa8] sm:$0xff]   ;;  %v435_v5 = vand.u32 127, %v434_v4 }
  0x1b   :  { %542 = vmatprep.subr.bf16.mxu0 %v644_v0  ;;  %v458_v35 = vld [vmem:[%s742_s3 + $0x1] ss:$0 sm:$0xff]  ;;  %v611_v43 = vld [vmem:[#allocation2 + $0xb0] sm:$0xff]   ;;  %v612_v44 = vld [vmem:[#allocation2 + $0xb8] sm:$0xff]  }
  0x1c   :  { %v467_v45 = vld [vmem:[%s742_s3 + $0x2] ss:$0 sm:$0xff]  ;;  %v476_v53 = vld [vmem:[%s742_s3 + $0x3] ss:$0 sm:$0xff]  ;;  %vm437_vm3 = vcmp.eq.s32.totalorder %v435_v5, 2  ;;  %vm436_vm4 = vcmp.eq.s32.totalorder %v435_v5, 1 }
  0x1d   :  { %525 = vmatpush3.bf16.msra.mxu1 %v591_v7 }
  0x1e   :  { %526 = vmatprep.subr.bf16.mxu1 %v644_v0  ;;  %543 = vmatpush3.bf16.msra.mxu0 %v598_v14 }
  0x1f   :  { %544 = vmatprep.subr.bf16.mxu0 %v644_v0 }
  0x21   :  { %527 = vmatpush3.bf16.msra.mxu1 %v592_v8 }
  0x22   :  { %528 = vmatprep.subr.bf16.mxu1 %v644_v0  ;;  %545 = vmatpush3.bf16.msra.mxu0 %v599_v15 }
  0x23   :  { %546 = vmatprep.subr.bf16.mxu0 %v644_v0 }
  0x25   :  { %529 = vmatpush3.bf16.msra.mxu1 %v593_v9 }
  0x26   :  { %530 = vmatprep.subr.bf16.mxu1 %v644_v0  ;;  %547 = vmatpush3.bf16.msra.mxu0 %v600_v16 }
  0x27   :  { %548 = vmatprep.subr.bf16.mxu0 %v644_v0 }
  0x29   :  { %531 = vmatpush3.bf16.msra.mxu1 %v594_v10 }
  0x2a   :  { %532 = vmatprep.subr.bf16.mxu1 %v644_v0  ;;  %549 = vmatpush3.bf16.msra.mxu0 %v601_v17 }
  0x2b   :  { %550 = vmatprep.subr.bf16.mxu0 %v644_v0 }
  0x2d   :  { %533 = vmatpush3.bf16.msra.mxu1 %v595_v11 }
  0x2e   :  { %534 = vmatprep.subr.bf16.mxu1 %v644_v0  ;;  %551 = vmatpush3.bf16.msra.mxu0 %v602_v18 }
  0x2f   :  { %552 = vmatprep.subr.bf16.mxu0 %v644_v0 }
  0x31   :  { %535 = vmatpush3.bf16.msra.mxu1 %v596_v12 }
  0x32   :  { %560 = vmatprep.subr.bf16.mxu1 %v644_v0  ;;  %553 = vmatpush3.bf16.msra.mxu0 %v603_v27 }
  0x33   :  { %554 = vmatprep.subr.bf16.mxu0 %v644_v0 }
  0x36   :  { %555 = vmatpush3.bf16.msra.mxu0 %v604_v28 }
  0xeb   :  { %v135_v20 = vpop.f32.mrb[0].mxu0 }
  0xec   :  { %v136_v21 = vadd.f32 %v456_v19, %v135_v20  ;;  %v518_v22 = vpop.f32.mrb[1].mxu0 }
  0xed   :  { %v138_v23 = vpop.f32.mrb[2].mxu0 }
  0xee   :  { %v141_v24 = vmax.f32 %v136_v21, 0.0  ;;  %v519_v25 = vpop.f32.mrb[3].mxu0 }
  0xf0   :  { %v142_v26 = vpack.c.bf16 %v141_v24, %v141_v24 }
  0xf2   :  { %537 = vmatmul.mubr.bf16.vlgmr.msra.gmra.mrb[0].mxu1 %v142_v26 }
  0xf3   :  { %576 = vmatprep.mubr.msk.bf16.mxu1 %vm645_vm0, %v644_v0  ;;  %561 = vmatpush3.bf16.msra.mxu1 %v605_v29 }
  0xf4   :  { %562 = vmatprep.subr.bf16.mxu1 %v644_v0 }
  0xf7   :  { %563 = vmatpush3.bf16.msra.mxu1 %v606_v30 }
  0xf8   :  { %564 = vmatprep.subr.bf16.mxu1 %v644_v0 }
  0xfb   :  { %565 = vmatpush3.bf16.msra.mxu1 %v607_v31 }
  0xfc   :  { %566 = vmatprep.subr.bf16.mxu1 %v644_v0 }
  0xff   :  { %567 = vmatpush3.bf16.msra.mxu1 %v608_v32 }
 0x100   :  { %568 = vmatprep.subr.bf16.mxu1 %v644_v0 }
 0x103   :  { %569 = vmatpush3.bf16.msra.mxu1 %v609_v33 }
 0x104   :  { %570 = vmatprep.subr.bf16.mxu1 %v644_v0 }
 0x107   :  { %571 = vmatpush3.bf16.msra.mxu1 %v610_v34 }
 0x108   :  { %572 = vmatprep.subr.bf16.mxu1 %v644_v0 }
 0x10b   :  { %573 = vmatpush3.bf16.msra.mxu1 %v611_v43 }
 0x10c   :  { %574 = vmatprep.subr.bf16.mxu1 %v644_v0 }
 0x10f   :  { %575 = vmatpush3.bf16.msra.mxu1 %v612_v44 }
 0x1c5   :  { %v229_v36 = vpop.f32.mrb[0].mxu1 }
 0x1c6   :  { %v230_v37 = vadd.f32 %v458_v35, %v229_v36  ;;  %v538_v38 = vpop.f32.mrb[1].mxu1 }
 0x1c7   :  { %v232_v39 = vpop.f32.mrb[2].mxu1 }
 0x1c8   :  { %v235_v40 = vmax.f32 %v230_v37, 0.0  ;;  %v539_v41 = vpop.f32.mrb[3].mxu1 }
 0x1ca   :  { %v236_v42 = vpack.c.bf16 %v235_v40, %v235_v40 }
 0x1cc   :  { %557 = vmatmul.mubr.bf16.vlgmr.msra.gmra.mrb[4].mxu0 %v236_v42 }
 0x29f   :  { %v323_v46 = vpop.f32.mrb[4].mxu0 }
 0x2a0   :  { %v324_v47 = vadd.f32 %v467_v45, %v323_v46  ;;  %v558_v48 = vpop.f32.mrb[5].mxu0 }
 0x2a1   :  { %v326_v49 = vpop.f32.mrb[6].mxu0 }
 0x2a2   :  { %v329_v50 = vmax.f32 %v324_v47, 0.0  ;;  %v559_v51 = vpop.f32.mrb[7].mxu0 }
 0x2a4   :  { %v330_v52 = vpack.c.bf16 %v329_v50, %v329_v50 }
 0x2a6   :  { %577 = vmatmul.mubr.bf16.vlgmr.msra.gmra.mrb[4].mxu1 %v330_v52 }
 0x379   :  { %v417_v54 = vpop.f32.mrb[4].mxu1 }
 0x37a   :  { %v418_v55 = vadd.f32 %v476_v53, %v417_v54  ;;  %v578_v56 = vpop.f32.mrb[5].mxu1 }
 0x37b   :  { %v420_v57 = vpop.f32.mrb[6].mxu1 }
 0x37c   :  { %424 = vrot.lane.b32.xlu0 %v418_v55, %s646_s12  ;;  %v579_v58 = vpop.f32.mrb[7].mxu1 }
 0x3ee   :  { %v425_v60 = vpop.permute.xlu0 %424 }
 0x3ef   :  { %v427_v61 = vsub.f32 %v418_v55, %v425_v60 }
 0x3f1   :  { %v428_v62 = vmin.f32 %v427_v61, 60.0 }
 0x3f3   :  { %v429_v63 = vmul.f32 1.442695, %v428_v62 }
 0x3f5   :  { %613 = vpow2.f32 %v429_v63 }
 0x3ff   :  { %v614_v0 = vpop.eup %613 }
 0x400   :  { %v431_v1 = vadd.f32 1.0, %v614_v0 }
 0x402   :  { %615 = vrcp.f32 %v431_v1 }
 0x40c   :  { %v616_v2 = vpop.eup %615 }
 0x40d   :  { %440 = vperm.xlu0 %587, %v616_v2   ;;  %v433_v3 = vsub.f32 1.0, %v616_v2 }
 0x40f   :  { %446 = vperm.xlu1 %588, %v433_v3  }
 0x48c   :  { %v441_v6 = vpop.permute.xlu0 %440 }
 0x48d   :  { %v443_v7 = vsel %vm437_vm3, %v441_v6, %v418_v55 }
 0x48e   :  { %v447_v8 = vpop.permute.xlu1 %446 }
 0x48f   :  { %v449_v9 = vsel %vm436_vm4, %v447_v8, %v443_v7 }
 0x490   :  { %450 = vst [vmem:[%s743_s4] sm:$0xff] %v449_v9 }
 0x491   :  { %455 = vsyncpa [#allocation3], 1 }

</bundles_post_ra>
